<compile_context>
chip_gen: v7x
topology: tpu7x:2x2x1
jax: 0.10.0
libtpu: 0.0.40
codegen_flags: <defaults>
</compile_context>

<pallas_src>
import functools

import jax
import jax.numpy as jnp
from jax.experimental import pallas as pl
from jax.experimental.pallas import tpu as pltpu


# --------------------------------------------------------------------------
# hardware / budget helpers
# --------------------------------------------------------------------------
def _round_up(x, m):
    return ((x + m - 1) // m) * m


def _cdiv(a, b):
    return -(-a // b)


def _sublane(dtype):
    # f32 -> 8, bf16 -> 16, int8/fp8 -> 32 (sublane packing granularity).
    itemsize = jnp.dtype(dtype).itemsize
    return 8 * max(1, 4 // max(1, itemsize))


def _vmem_capacity_bytes():
    try:
        return int(pltpu.get_tpu_info().vmem_capacity_bytes)
    except Exception:
        return 64 << 20  # v7x-safe fallback


_VMEM_CAP = _vmem_capacity_bytes()
_VMEM_BUDGET = int(0.70 * _VMEM_CAP)    # working-set budget for the auto-tiler
_VMEM_CEILING = int(0.90 * _VMEM_CAP)   # hard cap handed to Mosaic
_MIN_ROW_STEPS = 8                      # >= 4 grid steps per TC on 2-TC chips


def _pick_tile_rows(n_rows, per_row_bytes, sublane, budget_bytes):
    """Largest row tile whose per-block working set fits in budget_bytes."""
    t = max(budget_bytes, per_row_bytes) // max(per_row_bytes, 1)
    t = (t // sublane) * sublane
    t = min(t, 1024)
    # Keep enough grid steps for pipelining / megacore sharding of the row axis.
    t = min(t, _round_up(_cdiv(n_rows, _MIN_ROW_STEPS), sublane))
    t = min(t, _round_up(n_rows, sublane))
    return max(sublane, t)


def _vmem_limit(estimate_bytes):
    return int(min(_VMEM_CEILING, max(16 << 20, estimate_bytes)))


def _invariant_spec(block_shape, index_map):
    """BlockSpec for a grid-invariant operand: single-buffer it."""
    try:
        return pl.BlockSpec(block_shape, index_map, pipeline_mode=pl.Buffered(1))
    except TypeError:   # older jax without pipeline_mode on BlockSpec
        return pl.BlockSpec(block_shape, index_map)


# --------------------------------------------------------------------------
# Fused PreNorm + Linear kernel (fast path when fn is a Linear)
# --------------------------------------------------------------------------
def _prenorm_linear_kernel(x_ref, w_ref, bias_ref, o_ref, xhat_ref, *, eps):
    # x_ref: (tile_m, dim_in); w_ref: (dim_in, tile_n); bias_ref: (1, tile_n);
    # o_ref: (tile_m, tile_n); xhat_ref: VMEM scratch (tile_m, dim_in).
    j = pl.program_id(1)

    # Normalize this row tile once (j == 0) and reuse it for every column tile.
    @pl.when(j == 0)
    def _():
        x = x_ref[...].astype(jnp.float32)
        inv_d = 1.0 / x.shape[-1]
        mean = jnp.sum(x, axis=-1, keepdims=True) * inv_d
        mean_sq = jnp.sum(x * x, axis=-1, keepdims=True) * inv_d
        var = jnp.maximum(mean_sq - mean * mean, 0.0)     # guard cancellation
        inv_std = jax.lax.rsqrt(var + eps)
        xhat_ref[...] = ((x - mean) * inv_std).astype(xhat_ref.dtype)

    # MXU matmul in the weight dtype, f32 accumulation. gamma is already
    # folded into w, beta into bias (see wrapper).
    acc = jnp.dot(xhat_ref[...], w_ref[...], preferred_element_type=jnp.float32)
    o_ref[...] = (acc + bias_ref[...].astype(jnp.float32)).astype(o_ref.dtype)


def prenorm_linear(x, gamma, beta, w, b, *, eps=1e-5, tile_rows=None,
                   tile_cols=None):
    """y = LayerNorm(x; gamma, beta, eps) @ w + b, fused in one pallas_call."""
    orig_shape = x.shape
    dim_in = orig_shape[-1]
    dim_out = w.shape[1]
    x2 = x.reshape(-1, dim_in)
    n = x2.shape[0]

    # Fold the LayerNorm affine into the linear parameters.
    w_f32 = w.astype(jnp.float32)
    w_eff = (gamma.astype(jnp.float32)[:, None] * w_f32).astype(w.dtype)
    bias_eff = (beta.astype(jnp.float32) @ w_f32
                + b.astype(jnp.float32)).reshape(1, dim_out)

    xsz = jnp.dtype(x.dtype).itemsize
    wsz = jnp.dtype(w.dtype).itemsize
    osz = xsz
    sub = _sublane(x.dtype)

    # --- N (dim_out) tiling: keep the weight pipelined when it would not fit
    # comfortably resident (matters first on v7x's 64 MiB VMEM). LayerNorm
    # stays fused: the full dim_in of every row tile is always in one block.
    w_full_bytes = dim_in * dim_out * wsz
    if tile_cols is not None:
        tile_n = tile_cols
        w_resident = tile_n >= dim_out
    elif dim_out <= 128 or w_full_bytes <= _VMEM_BUDGET // 3:
        tile_n = dim_out
        w_resident = True
    else:
        per_col128 = 2 * dim_in * wsz * 128        # double-buffered weight cols
        tile_n = max(128, ((_VMEM_BUDGET // 3) // per_col128) * 128)
        tile_n = min(tile_n, _round_up(dim_out, 128))
        w_resident = False
    n_tiles = _cdiv(dim_out, tile_n)
    w_bufs = 1 if w_resident else 2

    # --- Row (M) tiling, including the f32 intermediates inside the kernel.
    per_row = (2 * dim_in * xsz            # x block, double-buffered
               + 2 * dim_in * 4            # f32 x / (x - mean)*inv_std temps
               + dim_in * wsz              # x_hat VMEM scratch
               + 2 * tile_n * osz          # output block, double-buffered
               + tile_n * 4)               # f32 accumulator
    row_budget = _VMEM_BUDGET - w_bufs * dim_in * tile_n * wsz - 2 * tile_n * 4
    tile_m = tile_rows or _pick_tile_rows(n, per_row, sub,
                                          max(row_budget, per_row * sub))

    est = (tile_m * per_row
           + w_bufs * dim_in * tile_n * wsz
           + tile_m * max(dim_in, tile_n) * 4     # extra f32 temp headroom
           + 2 * tile_n * 4
           + (2 << 20))

    # TODO(synk): if dim_in / dim_out are not multiples of 128, pad the
    # parameters (zeros in gamma/beta/W rows & cols) at load time for
    # lane-dense blocks and unmasked stores.

    w_index = lambda i, j: (0, j)
    bias_index = lambda i, j: (0, j)
    if w_resident:
        w_spec = _invariant_spec((dim_in, tile_n), w_index)
        bias_spec = _invariant_spec((1, tile_n), bias_index)
    else:
        w_spec = pl.BlockSpec((dim_in, tile_n), w_index)
        bias_spec = pl.BlockSpec((1, tile_n), bias_index)

    out = pl.pallas_call(
        functools.partial(_prenorm_linear_kernel, eps=eps),
        out_shape=jax.ShapeDtypeStruct((n, dim_out), x.dtype),
        grid_spec=pltpu.PrefetchScalarGridSpec(
            num_scalar_prefetch=0,
            grid=(_cdiv(n, tile_m), n_tiles),
            in_specs=[
                pl.BlockSpec((tile_m, dim_in), lambda i, j: (i, 0)),
                w_spec,
                bias_spec,
            ],
            out_specs=pl.BlockSpec((tile_m, tile_n), lambda i, j: (i, j)),
            scratch_shapes=[pltpu.VMEM((tile_m, dim_in), w.dtype)],
        ),
        compiler_params=pltpu.CompilerParams(
            dimension_semantics=("parallel", "arbitrary"),
            vmem_limit_bytes=_vmem_limit(est),
        ),
    )(x2, w_eff, bias_eff)

    return out.reshape(orig_shape[:-1] + (dim_out,))


# --------------------------------------------------------------------------
# Standalone LayerNorm kernel (generic-fn path of PreNorm)
# --------------------------------------------------------------------------
def _layernorm_kernel(x_ref, g_ref, b_ref, o_ref, *, eps):
    x = x_ref[...].astype(jnp.float32)
    inv_d = 1.0 / x.shape[-1]
    mean = jnp.sum(x, axis=-1, keepdims=True) * inv_d
    mean_sq = jnp.sum(x * x, axis=-1, keepdims=True) * inv_d
    var = jnp.maximum(mean_sq - mean * mean, 0.0)
    inv_std = jax.lax.rsqrt(var + eps)
    y = (x - mean) * inv_std * g_ref[...].astype(jnp.float32) \
        + b_ref[...].astype(jnp.float32)
    o_ref[...] = y.astype(o_ref.dtype)


def layernorm(x, gamma, beta, *, eps=1e-5, tile_rows=None):
    """LayerNorm over the last axis of x (any leading shape)."""
    orig_shape = x.shape
    dim = orig_shape[-1]
    x2 = x.reshape(-1, dim)
    n = x2.shape[0]

    xsz = jnp.dtype(x.dtype).itemsize
    sub = _sublane(x.dtype)
    # in + out blocks (double-buffered) + f32 temps (x cast, y).
    per_row = 2 * dim * xsz + 2 * dim * xsz + 3 * dim * 4
    tile_m = tile_rows or _pick_tile_rows(n, per_row, sub, _VMEM_BUDGET)
    est = tile_m * per_row + 4 * dim * 4 + (2 << 20)

    out = pl.pallas_call(
        functools.partial(_layernorm_kernel, eps=eps),
        out_shape=jax.ShapeDtypeStruct((n, dim), x.dtype),
        grid_spec=pltpu.PrefetchScalarGridSpec(
            num_scalar_prefetch=0,
            grid=(_cdiv(n, tile_m),),
            in_specs=[
                pl.BlockSpec((tile_m, dim), lambda i: (i, 0)),
                _invariant_spec((1, dim), lambda i: (0, 0)),
                _invariant_spec((1, dim), lambda i: (0, 0)),
            ],
            out_specs=pl.BlockSpec((tile_m, dim), lambda i: (i, 0)),
        ),
        compiler_params=pltpu.CompilerParams(
            dimension_semantics=("parallel",),
            vmem_limit_bytes=_vmem_limit(est),
        ),
    )(x2, gamma.reshape(1, dim), beta.reshape(1, dim))

    return out.reshape(orig_shape)


# --------------------------------------------------------------------------
# Standalone Linear kernel (building block for generic fns)
# --------------------------------------------------------------------------
def _linear_kernel(x_ref, w_ref, b_ref, o_ref):
    acc = jnp.dot(x_ref[...].astype(w_ref.dtype), w_ref[...],
                  preferred_element_type=jnp.float32)
    o_ref[...] = (acc + b_ref[...].astype(jnp.float32)).astype(o_ref.dtype)


def linear(x, w, b, *, tile_rows=None):
    """y = x @ w + b, w: (dim_in, dim_out), b: (dim_out,)."""
    orig_shape = x.shape
    dim_in = orig_shape[-1]
    dim_out = w.shape[1]
    x2 = x.reshape(-1, dim_in)
    n = x2.shape[0]

    xsz = jnp.dtype(x.dtype).itemsize
    wsz = jnp.dtype(w.dtype).itemsize
    sub = _sublane(x.dtype)
    per_row = (2 * dim_in * xsz + 2 * dim_out * xsz
               + dim_in * wsz          # cast temp for MXU input
               + dim_out * 4)          # f32 accumulator
    row_budget = max(_VMEM_BUDGET - dim_in * dim_out * wsz, per_row * sub)
    tile_m = tile_rows or _pick_tile_rows(n, per_row, sub, row_budget)
    est = tile_m * per_row + dim_in * dim_out * wsz + 2 * dim_out * 4 + (2 << 20)
    # TODO(synk): N-tile the weight here too (as prenorm_linear does) if a
    # generic-path Linear ever has a weight too large to sit resident in VMEM.

    out = pl.pallas_call(
        _linear_kernel,
        out_shape=jax.ShapeDtypeStruct((n, dim_out), x.dtype),
        grid_spec=pltpu.PrefetchScalarGridSpec(
            num_scalar_prefetch=0,
            grid=(_cdiv(n, tile_m),),
            in_specs=[
                pl.BlockSpec((tile_m, dim_in), lambda i: (i, 0)),
                _invariant_spec((dim_in, dim_out), lambda i: (0, 0)),
                _invariant_spec((1, dim_out), lambda i: (0, 0)),
            ],
            out_specs=pl.BlockSpec((tile_m, dim_out), lambda i: (i, 0)),
        ),
        compiler_params=pltpu.CompilerParams(
            dimension_semantics=("parallel",),
            vmem_limit_bytes=_vmem_limit(est),
        ),
    )(x2, w, b.reshape(1, dim_out))

    return out.reshape(orig_shape[:-1] + (dim_out,))


# --------------------------------------------------------------------------
# Modules (parameters in plain JAX, compute in Pallas)
# --------------------------------------------------------------------------
class Linear:
    """Demo `fn`: Linear(dim_in, dim_out) implemented as a Pallas matmul."""

    def __init__(self, w, b):
        self.w = w
        self.b = b

    def __call__(self, x):
        return linear(x, self.w, self.b)


class PreNorm:
    def __init__(self, dim, fn, eps=1e-5):
        # nn.LayerNorm(dim) init: weight = ones, bias = zeros (deterministic).
        self.gamma = jnp.ones((dim,), dtype=jnp.float32)
        self.beta = jnp.zeros((dim,), dtype=jnp.float32)
        self.fn = fn
        self.eps = eps

    def __call__(self, x, **kwargs):
        # Fast path: LayerNorm fused into the Linear matmul (single HBM pass).
        if isinstance(self.fn, Linear) and not kwargs:
            return prenorm_linear(x, self.gamma, self.beta,
                                  self.fn.w, self.fn.b, eps=self.eps)
        # Generic path: standalone LayerNorm kernel, then arbitrary fn.
        return self.fn(layernorm(x, self.gamma, self.beta, eps=self.eps), **kwargs)


if __name__ == "__main__":
    # dim is a multiple of 128 so every block is lane-dense (unmasked stores,
    # full MXU width).
    batch, seq, dim = 2, 8, 128
    eps = 1e-5

    key = jax.random.PRNGKey(0)
    kx, kw, kb = jax.random.split(key, 3)
    x = jax.random.normal(kx, (batch, seq, dim), dtype=jnp.float32)
    w = jax.random.normal(kw, (dim, dim), dtype=jnp.float32) * 0.02
    b = jax.random.normal(kb, (dim,), dtype=jnp.float32) * 0.01

    def ln_ref(xv):
        mean = jnp.mean(xv, axis=-1, keepdims=True)
        var = jnp.mean((xv - mean) ** 2, axis=-1, keepdims=True)
        return (xv - mean) / jnp.sqrt(var + eps)

    # 1) Fused PreNorm + Linear (the fast path).
    block = PreNorm(dim, Linear(w, b))
    out = jax.block_until_ready(block(x))
    ref = ln_ref(x) @ w + b
    assert out.shape == (batch, seq, dim)
    assert jnp.allclose(out, ref, atol=1e-4, rtol=1e-4)

    # 2) Generic-fn path (standalone LayerNorm kernel + arbitrary fn).
    block_generic = PreNorm(dim, lambda h: h * 1.0)
    out_generic = jax.block_until_ready(block_generic(x))
    assert jnp.allclose(out_generic, ln_ref(x), atol=1e-4, rtol=1e-4)

    # 3) Standalone Linear kernel (used when a generic fn is a Linear module).
    y_lin = jax.block_until_ready(linear(x, w, b))
    assert jnp.allclose(y_lin, x @ w + b, atol=1e-4, rtol=1e-4)

    print("KERNEL_OK")
</pallas_src>

<mosaic_0001>
module attributes {stable_mosaic.version = 11 : i64} {
  func.func @_prenorm_linear_kernel(%arg0: i32, %arg1: i32, %arg2: memref<8x128xf32, #tpu.memory_space<vmem>>, %arg3: memref<128x128xf32, #tpu.memory_space<vmem>>, %arg4: memref<1x128xf32, #tpu.memory_space<vmem>>, %arg5: memref<8x128xf32, #tpu.memory_space<vmem>>, %arg6: memref<8x128xf32, #tpu.memory_space<vmem>>) attributes {dimension_semantics = [#tpu.dimension_semantics<parallel>, #tpu.dimension_semantics<arbitrary>], iteration_bounds = array<i64: 2, 1>, scalar_prefetch = 0 : i64, scratch_operands = 1 : i64, tpu.core_type = #tpu.core_type<tc>, window_params = [{transform_indices = @transform_0, window_bounds = array<i64: 8, 128>}, {pipeline_mode = #tpu.pipeline_mode<synchronous>, transform_indices = @transform_1, window_bounds = array<i64: 128, 128>}, {pipeline_mode = #tpu.pipeline_mode<synchronous>, transform_indices = @transform_2, window_bounds = array<i64: 1, 128>}, {transform_indices = @transform_3, window_bounds = array<i64: 8, 128>}]} {
    %c0_i32 = arith.constant 0 : i32
    %0 = arith.cmpi eq, %arg1, %c0_i32 : i32
    %1 = arith.extui %0 : i1 to i32
    %c0_i32_0 = arith.constant 0 : i32
    %2 = arith.cmpi ne, %1, %c0_i32_0 : i32
    scf.if %2 {
      %c0_8 = arith.constant 0 : index
      %c0_9 = arith.constant 0 : index
      %10 = vector.load %arg2[%c0_8, %c0_9] : memref<8x128xf32, #tpu.memory_space<vmem>>, vector<8x128xf32>
      %cst_10 = arith.constant dense<0.000000e+00> : vector<8xf32>
      %11 = vector.multi_reduction <add>, %10, %cst_10 [1] : vector<8x128xf32> to vector<8xf32>
      %12 = vector.shape_cast %11 : vector<8xf32> to vector<8x1xf32>
      %cst_11 = arith.constant 7.812500e-03 : f32
      %13 = vector.broadcast %cst_11 : f32 to vector<8x1xf32>
      %14 = arith.mulf %12, %13 : vector<8x1xf32>
      %15 = arith.mulf %10, %10 : vector<8x128xf32>
      %cst_12 = arith.constant dense<0.000000e+00> : vector<8xf32>
      %16 = vector.multi_reduction <add>, %15, %cst_12 [1] : vector<8x128xf32> to vector<8xf32>
      %17 = vector.shape_cast %16 : vector<8xf32> to vector<8x1xf32>
      %cst_13 = arith.constant 7.812500e-03 : f32
      %18 = vector.broadcast %cst_13 : f32 to vector<8x1xf32>
      %19 = arith.mulf %17, %18 : vector<8x1xf32>
      %20 = arith.mulf %14, %14 : vector<8x1xf32>
      %21 = arith.subf %19, %20 : vector<8x1xf32>
      %cst_14 = arith.constant 0.000000e+00 : f32
      %22 = vector.broadcast %cst_14 : f32 to vector<8x1xf32>
      %23 = arith.maximumf %21, %22 : vector<8x1xf32>
      %cst_15 = arith.constant 9.99999974E-6 : f32
      %24 = vector.broadcast %cst_15 : f32 to vector<8x1xf32>
      %25 = arith.addf %23, %24 : vector<8x1xf32>
      %26 = math.rsqrt %25 : vector<8x1xf32>
      %27 = vector.broadcast %14 : vector<8x1xf32> to vector<8x128xf32>
      %28 = arith.subf %10, %27 : vector<8x128xf32>
      %29 = vector.broadcast %26 : vector<8x1xf32> to vector<8x128xf32>
      %30 = arith.mulf %28, %29 : vector<8x128xf32>
      %c0_16 = arith.constant 0 : index
      %c0_17 = arith.constant 0 : index
      %31 = vector.load %arg6[%c0_16, %c0_17] : memref<8x128xf32, #tpu.memory_space<vmem>>, vector<8x128xf32>
      tpu.vector_store %arg6[%c0_16, %c0_17], %30 {strides = array<i32>} : memref<8x128xf32, #tpu.memory_space<vmem>>, vector<8x128xf32>,
    } else {
    }
    %c0 = arith.constant 0 : index
    %c0_1 = arith.constant 0 : index
    %3 = vector.load %arg6[%c0, %c0_1] : memref<8x128xf32, #tpu.memory_space<vmem>>, vector<8x128xf32>
    %c0_2 = arith.constant 0 : index
    %c0_3 = arith.constant 0 : index
    %4 = vector.load %arg3[%c0_2, %c0_3] : memref<128x128xf32, #tpu.memory_space<vmem>>, vector<128x128xf32>
    %cst = arith.constant dense<0.000000e+00> : vector<8x128xf32>
    %5 = tpu.matmul %3, %4, %cst {dimension_numbers = #tpu.dot_dimension_numbers<[1], [0], [0], [1], [0, 0, 1, 1], [], []>} : vector<8x128xf32>, vector<128x128xf32>, vector<8x128xf32> -> vector<8x128xf32>
    %c0_4 = arith.constant 0 : index
    %c0_5 = arith.constant 0 : index
    %6 = vector.load %arg4[%c0_4, %c0_5] : memref<1x128xf32, #tpu.memory_space<vmem>>, vector<1x128xf32>
    %7 = vector.broadcast %6 : vector<1x128xf32> to vector<8x128xf32>
    %8 = arith.addf %5, %7 : vector<8x128xf32>
    %c0_6 = arith.constant 0 : index
    %c0_7 = arith.constant 0 : index
    %9 = vector.load %arg5[%c0_6, %c0_7] : memref<8x128xf32, #tpu.memory_space<vmem>>, vector<8x128xf32>
    tpu.vector_store %arg5[%c0_6, %c0_7], %8 {strides = array<i32>} : memref<8x128xf32, #tpu.memory_space<vmem>>, vector<8x128xf32>,
    return
  }
  func.func @transform_0(%arg0: i32, %arg1: i32) -> (i32, i32) {
    %c0_i32 = arith.constant 0 : i32
    %c0_i32_0 = arith.constant 0 : i32
    return %arg0, %c0_i32 : i32, i32
  }
  func.func @transform_1(%arg0: i32, %arg1: i32) -> (i32, i32) {
    %c0_i32 = arith.constant 0 : i32
    %c0_i32_0 = arith.constant 0 : i32
    return %c0_i32, %arg1 : i32, i32
  }
  func.func @transform_2(%arg0: i32, %arg1: i32) -> (i32, i32) {
    %c0_i32 = arith.constant 0 : i32
    %c0_i32_0 = arith.constant 0 : i32
    return %c0_i32, %arg1 : i32, i32
  }
  func.func @transform_3(%arg0: i32, %arg1: i32) -> (i32, i32) {
    %c0_i32 = arith.constant 0 : i32
    return %arg0, %arg1 : i32, i32
  }
}

</mosaic_0001>

<bundles_post_ra>
// kernel: tpu_custom_call.1
= control target key start
LH: loop header
LB: loop body
LE: loop exit
PB: predicated region body
PF: predicated region fallthrough
CT: control target
= control target key end

     0   :  { %8 = vsyncpa [#allocation4], 0  ;;  %s1037_s0 = inlined_call_operand.hbm [shape: f32[16,128], index: 0, kind: input, shape index: {}]   ;;  %s1038_s1 = inlined_call_operand.hbm [shape: f32[128,128], index: 1, kind: input, shape index: {}]   ;;  %s1039_s2 = inlined_call_operand.vmem [shape: f32[1,128], index: 2, kind: input, shape index: {}]   ;;  %s1040_s3 = inlined_call_operand.hbm [shape: f32[16,128], index: 3, kind: output, shape index: {}]  }
   0x1   :  { %10 = vsyncpa [#allocation4 + $0x1], 0 }
   0x2   :  { %11 = vsyncpa [#allocation7], 0 }
   0x3   :  { %12 = vsyncpa [#allocation5], 0 }
   0x4   :  { %14 = vsyncpa [#allocation5 + $0x1], 0  ;;  %s816_s12 = smov 0   ;;  %s818_s13 = smov 0  }
   0x5   :  { %s820_s14 = smov 0   ;;  %s822_s15 = smov 0  }
   0x6   :  { %s824_s16 = smov 0   ;;  %s826_s17 = smov 0  }
   0x7 LB: > { %s469_s18 = sadd.s32 4294967295, %s786_s17   ;;  %s470_s19 = sadd.s32 4294967294, %s786_s17   ;;  %s786_s17 = sphi %s826_s17, %s20_s17   ;;  %s782_s16 = sphi %s824_s16, %s1064_s16   ;;  %s778_s15 = sphi %s822_s15, %s1063_s15   ;;  %s774_s14 = sphi %s820_s14, %s1062_s14   ;;  %s770_s13 = sphi %s818_s13, %s1061_s13   ;;  %s766_s12 = sphi %s816_s12, %s1060_s12  }
   0x8   : > { %p52_p0 = scmp.ne.s32.totalorder %s770_s13, %s766_s12  ;;  %p850_p1 = scmp.eq.s32.totalorder %s469_s18, 0 }
   0x9   : > { %p854_p2 = scmp.eq.s32.totalorder %s469_s18, 1  ;;  %p136_p3 = scmp.eq.s32.totalorder %s470_s19, 1 }
   0xa   : > { %s1045_s20 = scalar_select %p850_p1, 1, 0 }
   0xb   : > { %s1046_s21 = scalar_select %p854_p2, 1, 0 }
   0xc   : > { %p860_p4 = por %p850_p1, %p52_p0  ;;  %p471_p5 = scmp.ge.s32.totalorder %s786_s17, 1 }
   0xd   : > { %p865_p6 = por %p136_p3, %p52_p0  ;;  %p143_p7 = scmp.lt.s32.totalorder %s786_s17, 3 }
   0xe   : > { %s1047_s22 = scalar_select %p860_p4, 1, 0 }
   0xf   : > { %s1048_s23 = scalar_select %p865_p6, 1, 0 }
  0x10   : > { %p870_p8 = pnand %p471_p5, %p143_p7  ;;  %s788_s25 = smov [#allocation6]  }
  0x11   : > { %s157_s26 = sshll.u32 %s788_s25, 4  ;;  %s32_s28 = sadd.s32 1, %s782_s16  ;;  %s158_s26 = int_to_ptr.vmem [resolvable:$true] %s157_s26 }
  0x12   : > { %s1049_s24 = scalar_select %p870_p8, 1, 0 }
  0x13   : > { %p570_p9 = pneg %p870_p8  ;;  %s642_s4 = scalar_lea.hbm %s1038_s1, 2048 }
  0x14   : > { %p643_p12 = scmp.ne.s32.totalorder %s1038_s1, %s642_s4  ;;  %p649_p5 = scmp.lt.u32.totalorder %s642_s4, %s1038_s1 }
  0x15   : > { %p879_p11 = pnand %p570_p9, %p850_p1 }
  0x17   : > { %p644_p13 = pneg %p879_p11 }
  0x19   : > { %p645_p0 = pnand %p644_p13, %p643_p12 }
  0x1b   : > { %p646_p3 = pneg %p645_p0 }
  0x1d   : > { %p651_p7 = pnand %p649_p5, %p646_p3 }
  0x1f   : > { %654 = shalt.err (!%p651_p7)
}
  0x20   : > { %s655_s9 = scalar_lea.vmem %s158_s26, 2048  ;;  %p663_p1 = scmp.lt.s32.totalorder %s158_s26, %s158_s26 }
  0x21   : > { %p656_p9 = scmp.ne.s32.totalorder %s158_s26, %s655_s9  ;;  %p664_p4 = scmp.lt.s32.totalorder %s655_s9, %s655_s9 }
  0x23   : > { %p658_p10 = pnand %p656_p9, %p644_p13  ;;  %p665_p8 = por %p664_p4, %p663_p1 }
  0x25   : > { %p659_p6 = pneg %p658_p10 }
  0x27   : > { %p666_p2 = pnand %p665_p8, %p659_p6 }
  0x29   : > { %669 = shalt.err (!%p666_p2)
}
  0x2a   : > { %s789_s10 = smov 128   ;;  %s790_s11 = smov 8  }
  0x2b   : > { %573 = dma.hbm_to_vmem [thread:$0]  (!%p879_p11), %s1038_s1, 2048, %s158_s26, [#allocation7], %s789_s10, %s789_s10, %s790_s11  }
  0x2c   : > { %p34_p1 = scmp.ge.s32.totalorder %s32_s28, 2  ;;  %s39_s25 = sadd.s32 1, %s774_s14 }
  0x2d   : > { %p46_p2 = scmp.ne.s32.totalorder %s774_s14, %s770_s13  ;;  %p47_p4 = scmp.eq.s32.totalorder %s786_s17, 0 }
  0x2e   : > { %s1066_s28 = smov (%p34_p1, %s32_s28), 0  ;;  %p1052_p8 = scmp.ne.s32.totalorder %s1046_s21, 0 }
  0x2f   : > { %p906_p6 = por %p47_p4, %p46_p2  ;;  %s36_s27 = ssub.s32 %s782_s16, %s1066_s28 }
  0x30   : > { %p912_p10 = por %p1052_p8, %p46_p2  ;;  %p583_p12 = scmp.lt.s32.totalorder %s786_s17, 2 }
  0x31   : > { %p37_p11 = scmp.eq.s32.totalorder %s36_s27, 0  ;;  %s177_s26 = sand.u32 1, %s774_s14  }
  0x32   : > { %s475_s4 = sshll.u32 %s177_s26, 3  ;;  %s476_s6 = sshll.u32 %s782_s16, 7 }
  0x33   : > { %s921_s5 = scalar_select %p37_p11, %s774_s14, %s39_s25  }
  0x34   : > { %s927_s9 = scalar_lea.hbm %s1037_s0, %s476_s6  ;;  %s181_s21 = scalar_lea.vmem [#allocation3], %s475_s4 }
  0x35   : > { %s188_s10 = sshll.u32 %s181_s21, 4  ;;  %p933_p13 = pnand %p583_p12, %p906_p6  ;;  %s929_s10 = int_to_ptr.vmem [resolvable:$true] %s188_s10 }
  0x36   : > { %s178_s18 = scalar_lea.sflag [#allocation4], %s177_s26  ;;  %s670_s19 = scalar_lea.hbm %s927_s9, 128 }
  0x37   : > { %p671_p0 = scmp.ne.s32.totalorder %s927_s9, %s670_s19  ;;  %p672_p3 = pneg %p933_p13 }
  0x38   : > { %s675_s4 = scalar_lea.hbm %s1037_s0, 256  ;;  %p676_p9 = scmp.lt.u32.totalorder %s927_s9, %s1037_s0 }
  0x39   : > { %p673_p5 = pnand %p672_p3, %p671_p0  ;;  %p677_p1 = scmp.lt.u32.totalorder %s675_s4, %s670_s19 }
  0x3a   : > { %p679_p4 = scmp.lt.u32.totalorder %s670_s19, %s927_s9 }
  0x3b   : > { %p674_p7 = pneg %p673_p5  ;;  %p678_p2 = por %p677_p1, %p676_p9 }
  0x3d   : > { %p680_p6 = por %p679_p4, %p678_p2 }
  0x3f   : > { %p681_p8 = pnand %p680_p6, %p674_p7 }
  0x41   : > { %684 = shalt.err (!%p681_p8)
}
  0x42   : > { %s685_s26 = scalar_lea.vmem %s929_s10, 128  ;;  %s791_s7 = smov [#allocation3]  }
  0x43   : > { %p686_p12 = scmp.ne.s32.totalorder %s929_s10, %s685_s26  ;;  %s690_s8 = sshll.u32 %s791_s7, 4  ;;  %s691_s8 = int_to_ptr.vmem [resolvable:$false] %s690_s8 }
  0x44   : > { %s692_s21 = scalar_lea.vmem %s691_s8, 256  ;;  %p693_p5 = scmp.lt.s32.totalorder %s929_s10, %s691_s8 }
  0x45   : > { %p688_p11 = pnand %p686_p12, %p672_p3  ;;  %p694_p9 = scmp.lt.s32.totalorder %s692_s21, %s685_s26 }
  0x47   : > { %p689_p0 = pneg %p688_p11  ;;  %p695_p1 = por %p694_p9, %p693_p5 }
  0x49   : > { %p696_p2 = pnand %p695_p1, %p689_p0 }
  0x4b   : > { %699 = shalt.err (!%p696_p2)
}
  0x4c   : > { %577 = dma.hbm_to_vmem [thread:$0]  (!%p933_p13), %s927_s9, 128, %s929_s10, %s178_s18  }
  0x4d   : > { %p1055_p7 = scmp.ne.s32.totalorder %s1049_s24, 0 }
  0x4e   : > { %s965_s19 = sand.u32 (!%p1055_p7), 1, %s770_s13   ;;  %p1056_p3 = scmp.ne.s32.totalorder (!%p1055_p7), %s1047_s22, 0 }
  0x4f   : > { %197 = sbr.rel (%p1055_p7) target bundleno = 486 (0x1e6), region = 32  ;;  %s478_s25 = sshll.u32 (!%p1055_p7), %s965_s19, 3 }
  0x50   : > { %s200_s27 = scalar_lea.sflag (!%p1055_p7), [#allocation4], %s965_s19  ;;  %s203_s4 = scalar_lea.vmem (!%p1055_p7), [#allocation3], %s478_s25 }
  0x56   : > { %753 = dma.done.wait (%p1056_p3), %s200_s27, 128  }
  0x57   : > { %755 = vsyncadd (%p1056_p3), %s200_s27, 4294967168  ;;  %p1057_p13 = scmp.ne.s32.totalorder %s1045_s20, 0 }
  0x59   : > { %757 = dma.done.wait (%p1057_p13), [#allocation7], 2048  }
  0x5a   : > { %759 = vsyncadd (%p1057_p13), [#allocation7], 4294965248  ;;  %v792_v0 = vmov 0.0|0.0   ;;  %v240_v1 = vld [vmem:[%s203_s4] sm:$0xff]  ;;  %v257_v2 = vld [vmem:[#allocation6] sm:$0xff]  ;;  %vm793_vm0 = vmmov 0  }
  0x5b   : > { %538 = vmatprep.subr.bf16.mxu0 %v792_v0  ;;  %v258_v3 = vld [vmem:[#allocation6 + $0x8] sm:$0xff]  ;;  %241 = vadd.xlane.f32.xlu0 %v240_v1  ;;  %v244_v4 = vmul.f32 %v240_v1, %v240_v1  ;;  %v259_v6 = vld [vmem:[#allocation6 + $0x10] sm:$0xff]  ;;  %v260_v7 = vld [vmem:[#allocation6 + $0x18] sm:$0xff]  ;;  %v794_v23 = vmov 0.0   ;;  %s483_s24 = sshll.u32 %s778_s15, 7  ;;  %s232_s9 = scalar_lea.vmem [#allocation8], %s478_s25 }
  0x5c   : > { %v539_v5 = vpack.c.bf16 %v258_v3, %v257_v2  ;;  %v542_v8 = vpack.c.bf16 %v260_v7, %v259_v6  ;;  %v261_v9 = vld [vmem:[#allocation6 + $0x20] sm:$0xff]  ;;  %v262_v10 = vld [vmem:[#allocation6 + $0x28] sm:$0xff]  ;;  %v263_v12 = vld [vmem:[#allocation6 + $0x30] sm:$0xff]  ;;  %535 = vmatprep.mubr.msk.f32.mxu0 %vm793_vm0, %v794_v23  ;;  %s366_s10 = sshll.u32 %s232_s9, 4  ;;  %s988_s29 = scalar_lea.hbm %s1040_s3, %s483_s24  ;;  %s990_s10 = int_to_ptr.vmem [resolvable:$true] %s366_s10 }
  0x5d   : > { %v545_v11 = vpack.c.bf16 %v262_v10, %v261_v9  ;;  %v264_v13 = vld [vmem:[#allocation6 + $0x38] sm:$0xff]  ;;  %v265_v15 = vld [vmem:[#allocation6 + $0x40] sm:$0xff]  ;;  %v266_v16 = vld [vmem:[#allocation6 + $0x48] sm:$0xff]  ;;  %s352_s6 = scalar_lea.sflag [#allocation5], %s965_s19  ;;  %s700_s26 = scalar_lea.vmem %s990_s10, 128 }
  0x5e   : > { %540 = vmatpush3.bf16.msra.mxu0 %v539_v5  ;;  %v548_v14 = vpack.c.bf16 %v264_v13, %v263_v12  ;;  %v551_v17 = vpack.c.bf16 %v266_v16, %v265_v15  ;;  %v267_v18 = vld [vmem:[#allocation6 + $0x50] sm:$0xff]  ;;  %v268_v19 = vld [vmem:[#allocation6 + $0x58] sm:$0xff]  ;;  %v269_v21 = vld [vmem:[#allocation6 + $0x60] sm:$0xff]  ;;  %p701_p4 = scmp.ne.s32.totalorder %s990_s10, %s700_s26  ;;  %s795_s15 = smov [#allocation8]  }
  0x5f   : > { %541 = vmatprep.subr.bf16.mxu0 %v792_v0  ;;  %245 = vadd.xlane.f32.xlu0 %v244_v4  ;;  %v554_v20 = vpack.c.bf16 %v268_v19, %v267_v18  ;;  %v270_v22 = vld [vmem:[#allocation6 + $0x68] sm:$0xff]  ;;  %v271_v25 = vld [vmem:[#allocation6 + $0x70] sm:$0xff]  ;;  %v272_v26 = vld [vmem:[#allocation6 + $0x78] sm:$0xff]  ;;  %s704_s7 = sshll.u32 %s795_s15, 4  ;;  %s705_s7 = int_to_ptr.vmem [resolvable:$false] %s704_s7 }
  0x60   : > { %v557_v24 = vpack.c.bf16 %v270_v22, %v269_v21  ;;  %v560_v27 = vpack.c.bf16 %v272_v26, %v271_v25  ;;  %v481_v39 = vld [vmem:[%s1039_s2] ss:$0 sm:$0xff]  ;;  %p702_p6 = pnand %p701_p4, %p912_p10  ;;  %s706_s8 = scalar_lea.vmem %s705_s7, 256 }
  0x61   : > { %p707_p12 = scmp.lt.s32.totalorder %s990_s10, %s705_s7  ;;  %p708_p11 = scmp.lt.s32.totalorder %s706_s8, %s700_s26 }
  0x62   : > { %543 = vmatpush3.bf16.msra.mxu0 %v542_v8  ;;  %p703_p8 = pneg %p702_p6 }
  0x63   : > { %544 = vmatprep.subr.bf16.mxu0 %v792_v0  ;;  %p709_p0 = por %p708_p11, %p707_p12 }
  0x65   : > { %p710_p5 = pnand %p709_p0, %p703_p8 }
  0x66   : > { %546 = vmatpush3.bf16.msra.mxu0 %v545_v11 }
  0x67   : > { %547 = vmatprep.subr.bf16.mxu0 %v792_v0 }
  0x6a   : > { %549 = vmatpush3.bf16.msra.mxu0 %v548_v14 }
  0x6b   : > { %550 = vmatprep.subr.bf16.mxu0 %v792_v0 }
  0x6e   : > { %552 = vmatpush3.bf16.msra.mxu0 %v551_v17 }
  0x6f   : > { %553 = vmatprep.subr.bf16.mxu0 %v792_v0 }
  0x72   : > { %555 = vmatpush3.bf16.msra.mxu0 %v554_v20 }
  0x73   : > { %556 = vmatprep.subr.bf16.mxu0 %v792_v0 }
  0x76   : > { %558 = vmatpush3.bf16.msra.mxu0 %v557_v24 }
  0x77   : > { %559 = vmatprep.subr.bf16.mxu0 %v792_v0 }
  0x7a   : > { %561 = vmatpush3.bf16.msra.mxu0 %v560_v27 }
  0xe8   : > { %v242_v28 = vpop.xlane.xlu0 %241 }
  0xe9   : > { %v243_v29 = vmul.f32 0.0078125, %v242_v28 }
  0xeb   : > { %v248_v31 = vmul.f32 %v243_v29, %v243_v29  ;;  %v253_v36 = vsub.f32 %v240_v1, %v243_v29 }
  0xec   : > { %v246_v30 = vpop.xlane.xlu0 %245 }
  0xed   : > { %v247_v32 = vmul.f32 0.0078125, %v246_v30 }
  0xef   : > { %v249_v33 = vsub.f32 %v247_v32, %v248_v31 }
  0xf1   : > { %v250_v34 = vmax.f32 %v249_v33, 0.0 }
  0xf3   : > { %v251_v35 = vadd.f32 1e-05, %v250_v34 }
  0xf5   : > { %640 = vrsqrt.f32 %v251_v35 }
  0xff   : > { %v641_v37 = vpop.eup %640 }
 0x100   : > { %v254_v38 = vmul.f32 %v641_v37, %v253_v36 }
 0x102   : > { %536 = vmatmul.mubr.f32.vlgmr.msra.gmra.mrb[0].mxu0 %v254_v38 }
 0x1d5   : > { %v346_v40 = vpop.f32.mrb[0].mxu0 }
 0x1d6   : > { %v347_v41 = vadd.f32 %v481_v39, %v346_v40  ;;  %v537_v42 = vpop.f32.mrb[1].mxu0 }
 0x1d8   : > { %350 = vst [vmem:[%s232_s9] sm:$0xff] %v347_v41 }
 0x1d9   : > { %713 = shalt.err (!%p710_p5)
}
 0x1da   : > { %s714_s21 = scalar_lea.hbm %s988_s29, 128  ;;  %s718_s27 = scalar_lea.hbm %s1040_s3, 256 }
 0x1db   : > { %p715_p9 = scmp.ne.s32.totalorder %s988_s29, %s714_s21  ;;  %p719_p7 = scmp.lt.u32.totalorder %s988_s29, %s1040_s3 }
 0x1dc   : > { %p720_p3 = scmp.lt.u32.totalorder %s718_s27, %s714_s21  ;;  %p722_p4 = scmp.lt.u32.totalorder %s714_s21, %s988_s29 }
 0x1dd   : > { %p716_p1 = pnand %p715_p9, %p912_p10 }
 0x1de   : > { %p721_p13 = por %p720_p3, %p719_p7 }
 0x1df   : > { %p717_p2 = pneg %p716_p1 }
 0x1e0   : > { %p723_p6 = por %p722_p4, %p721_p13 }
 0x1e2   : > { %p724_p8 = pnand %p723_p6, %p717_p2 }
 0x1e4   : > { %727 = shalt.err (!%p724_p8)
}
 0x1e5   : > { %568 = dma.vmem_to_hbm [thread:$0]  (%p912_p10), %s990_s10, 128, %s988_s29, %s352_s6  }
 0x1e6 PF: > { %s378_s22 = sand.u32 1, %s766_s12   ;;  %p1058_p12 = scmp.ne.s32.totalorder %s1048_s23, 0 }
 0x1e7   : > { %p1059_p11 = scmp.ge.s32.totalorder %s786_s17, 2  ;;  %s379_s24 = scalar_lea.sflag [#allocation5], %s378_s22 }
 0x1e9   : > { %p579_p0 = pnand %p1059_p11, %p1058_p12 }
 0x1eb   : > { %761 = dma.done.wait (!%p579_p0), %s379_s24, 128  }
 0x1ec   : > { %763 = vsyncadd (!%p579_p0), %s379_s24, 4294967168  ;;  %s20_s17 = sadd.s32 1, %s786_s17   ;;  %s1060_s12 = smov %s770_s13 }
 0x1ed   : > { %p17_p5 = scmp.ge.s32.totalorder %s20_s17, 4   ;;  %s1061_s13 = smov %s774_s14 }
 0x1ee   : > { %s1062_s14 = smov %s921_s5  ;;  %s1063_s15 = smov %s782_s16 }
 0x1ef   : > { %s1064_s16 = smov %s1066_s28  ;;  %19 = sbr.rel (!%p17_p5) target bundleno = 7 (0x7), region = 89 }
 0x1f6   :  { %384 = vsyncpa [#allocation4], 1 }
 0x1f7   :  { %386 = vsyncpa [#allocation4 + $0x1], 1 }
 0x1f8   :  { %387 = vsyncpa [#allocation7], 1 }
 0x1f9   :  { %388 = vsyncpa [#allocation5], 1 }
 0x1fa   :  { %390 = vsyncpa [#allocation5 + $0x1], 1 }

</bundles_post_ra>
